<compile_context>
chip_gen: v5e
topology: v5e:2x2
jax: 0.10.0
libtpu: 0.0.40
codegen_flags: <defaults>
</compile_context>

<pallas_src>
import functools

import jax
import jax.numpy as jnp
from jax.experimental import pallas as pl
from jax.experimental.pallas import tpu as pltpu

EPS = 1e-5  # nn.LayerNorm default


def _round_up(x, m):
    return (x + m - 1) // m * m


# ---------------------------------------------------------------------------
# Kernel
# ---------------------------------------------------------------------------
def _layernorm_padded(x, g, b, inv_n):
    # Single-pass stats (E[x^2] - mu^2).  Padded feature lanes of x are zero by
    # construction, so full-axis sums equal sums over the true H lanes and the
    # 1/H_true scale (inv_n) gives exact LayerNorm statistics.  Padded output
    # lanes are zeroed by g == 0, b == 0 there.
    mu = jnp.sum(x, axis=-1, keepdims=True) * inv_n
    var = jnp.sum(x * x, axis=-1, keepdims=True) * inv_n - mu * mu
    return (x - mu) * jax.lax.rsqrt(var + EPS) * g + b


def _adapter(x, g, be, wa, ba, wb, bb, inv_n):
    # MLP_adapter: LayerNorm -> Linear(H, H//m) -> ReLU -> Dropout(eval) -> Linear(H//m, H)
    # Matmul operands are cast to the (possibly bf16) weight dtype; accumulation
    # stays f32 via preferred_element_type.
    h = _layernorm_padded(x, g, be, inv_n)
    h = jnp.dot(h.astype(wa.dtype), wa, preferred_element_type=jnp.float32) + ba
    h = jnp.maximum(h, 0.0)
    h = jnp.dot(h.astype(wb.dtype), wb, preferred_element_type=jnp.float32) + bb
    return h


def _gate_kernel(x1_ref, x2_ref,
                 g1_ref, be1_ref, w1a_ref, b1a_ref, w1b_ref, b1b_ref,
                 g2_ref, be2_ref, w2a_ref, b2a_ref, w2b_ref, b2b_ref,
                 wg1_ref, wg2_ref, gn_ref, bn_ref,
                 bg_ref,                     # (1,) scalar in SMEM
                 o_ref, *, inv_h):
    x1 = x1_ref[...].astype(jnp.float32)
    x2 = x2_ref[...].astype(jnp.float32)

    h1 = _adapter(x1, g1_ref[...], be1_ref[...], w1a_ref[...], b1a_ref[...],
                  w1b_ref[...], b1b_ref[...], inv_h)
    h2 = _adapter(x2, g2_ref[...], be2_ref[...], w2a_ref[...], b2a_ref[...],
                  w2b_ref[...], b2b_ref[...], inv_h)

    # alpha = sigmoid(h1 @ W1.T + B1 + h2 @ W2.T)   -> (rows, 1)
    # kept as VPU multiply + single lane reduce (XLU) — off the MXU/VALU path.
    # (MXU offload of the reduction only pays if a bundle dump shows XLU-bound.)
    logit = jnp.sum(h1 * wg1_ref[...] + h2 * wg2_ref[...],
                    axis=-1, keepdims=True) + bg_ref[0]
    alpha = jnp.clip(jax.nn.sigmoid(logit), 0.15, 0.85)

    mixed = h1 * alpha + (1.0 - alpha) * h2
    o_ref[...] = _layernorm_padded(mixed, gn_ref[...], bn_ref[...],
                                   inv_h).astype(o_ref.dtype)


# ---------------------------------------------------------------------------
# Parameters (synthetic, matching the PyTorch module's shapes)
# ---------------------------------------------------------------------------
def init_gate_params(key, hidden_size, mlp_hidden_sz, dtype=jnp.float32):
    r = hidden_size // mlp_hidden_sz
    ks = jax.random.split(key, 12)

    def kaiming(k, shape, fan_in):
        return jax.random.normal(k, shape, dtype) * jnp.sqrt(2.0 / fan_in)

    return {
        # fc1 adapter
        "g1":  jnp.ones((1, hidden_size), dtype),
        "be1": jnp.zeros((1, hidden_size), dtype),
        "w1a": kaiming(ks[0], (hidden_size, r), hidden_size),   # (in, out)
        "b1a": jax.random.normal(ks[1], (1, r), dtype) * 0.01,
        "w1b": kaiming(ks[2], (r, hidden_size), r),
        "b1b": jax.random.normal(ks[3], (1, hidden_size), dtype) * 0.01,
        # fc2 adapter
        "g2":  jnp.ones((1, hidden_size), dtype),
        "be2": jnp.zeros((1, hidden_size), dtype),
        "w2a": kaiming(ks[4], (hidden_size, r), hidden_size),
        "b2a": jax.random.normal(ks[5], (1, r), dtype) * 0.01,
        "w2b": kaiming(ks[6], (r, hidden_size), r),
        "b2b": jax.random.normal(ks[7], (1, hidden_size), dtype) * 0.01,
        # gate weights (kaiming_normal_ in _init_weight)
        "wg1": kaiming(ks[8], (1, hidden_size), hidden_size),
        "wg2": kaiming(ks[9], (1, hidden_size), hidden_size),
        "bg":  kaiming(ks[10], (1, 1), 1),
        # final LayerNorm
        "gn":  jnp.ones((1, hidden_size), dtype),
        "bn":  jnp.zeros((1, hidden_size), dtype),
    }


_PARAM_ORDER = ("g1", "be1", "w1a", "b1a", "w1b", "b1b",
                "g2", "be2", "w2a", "b2a", "w2b", "b2b",
                "wg1", "wg2", "gn", "bn")


def prepare_gate_params(params, mxu_dtype=None):
    """Pad / cast parameters once (outside the per-call jit).

    Vectors (gamma/beta/biases/gate weights) are kept in f32; the four large
    adapter weight slabs are cast to `mxu_dtype` (e.g. jnp.bfloat16) if given —
    this is the explicit opt-in for bf16 MXU operands.
    """
    H = params["g1"].shape[-1]
    r = params["w1a"].shape[-1]
    Hp = _round_up(H, 128)
    rp = _round_up(r, 128)
    wdt = jnp.dtype(mxu_dtype) if mxu_dtype is not None else jnp.dtype(params["w1a"].dtype)

    def padto(a, shape, dtype=jnp.float32):
        a = a.astype(dtype)
        return jnp.pad(a, tuple((0, t - s) for s, t in zip(a.shape, shape)))

    prep = {
        "g1":  padto(params["g1"], (1, Hp)),
        "be1": padto(params["be1"], (1, Hp)),
        "w1a": padto(params["w1a"], (Hp, rp), wdt),
        "b1a": padto(params["b1a"], (1, rp)),
        "w1b": padto(params["w1b"], (rp, Hp), wdt),
        "b1b": padto(params["b1b"], (1, Hp)),
        "g2":  padto(params["g2"], (1, Hp)),
        "be2": padto(params["be2"], (1, Hp)),
        "w2a": padto(params["w2a"], (Hp, rp), wdt),
        "b2a": padto(params["b2a"], (1, rp)),
        "w2b": padto(params["w2b"], (rp, Hp), wdt),
        "b2b": padto(params["b2b"], (1, Hp)),
        "wg1": padto(params["wg1"], (1, Hp)),
        "wg2": padto(params["wg2"], (1, Hp)),
        "gn":  padto(params["gn"], (1, Hp)),
        "bn":  padto(params["bn"], (1, Hp)),
        "bg":  params["bg"].reshape(-1).astype(jnp.float32),   # scalar -> SMEM
    }
    return prep


# ---------------------------------------------------------------------------
# Wrapper
# ---------------------------------------------------------------------------
@functools.partial(jax.jit, static_argnames=("row_tile",))
def gate_forward(x1, x2, prep, *, row_tile=None):
    B, S, H = x1.shape
    rows = B * S
    Hp = prep["g1"].shape[-1]
    rp = prep["w1a"].shape[-1]
    assert Hp >= H and Hp % 128 == 0

    # ---- row tiling: multiple of 8 sublanes, sized for VMEM / megacore ----
    rt = row_tile if row_tile is not None else (128 if Hp >= 4096 else 256)
    rt = max(8, min(_round_up(rt, 8), _round_up(rows, 8)))
    grid = pl.cdiv(rows, rt)
    if grid > 1 and grid % 2 == 1:
        # Nudge toward an even grid so both v7x TensorCores get balanced work.
        rt = max(8, _round_up(pl.cdiv(rows, grid + 1), 8))
        grid = pl.cdiv(rows, rt)
    rows_pad = grid * rt

    # ---- activations: skip pad entirely when already aligned ----
    def pad_rows(x):
        xf = x.reshape(rows, H)
        if rows_pad == rows and Hp == H:
            return xf
        return jnp.pad(xf, ((0, rows_pad - rows), (0, Hp - H)))

    x1f = pad_rows(x1)
    x2f = pad_rows(x2)

    p_args = [prep[k] for k in _PARAM_ORDER]
    bg1d = prep["bg"]

    # Grid-invariant params: whole array resident ONCE in VMEM (no per-step
    # DMA, no double-buffering of the weight slabs).
    param_spec = pl.BlockSpec(memory_space=pltpu.MemorySpace.VMEM)
    bg_spec = pl.BlockSpec(memory_space=pltpu.MemorySpace.SMEM)
    row_spec = pl.BlockSpec((rt, Hp), lambda i: (i, 0))

    # ---- VMEM budget ----
    itemsize = jnp.dtype(x1.dtype).itemsize
    act_io = 3 * 2 * rt * Hp * itemsize                       # x1,x2,out, double-buffered
    f32_tmp = (6 * rt * Hp + 2 * rt * rp) * 4                 # x1,x2,h1,h2,mixed,LN temps + 2 bottleneck tiles
    param_bytes = sum(int(a.size) * a.dtype.itemsize for a in p_args)  # resident once
    est = act_io + f32_tmp + param_bytes
    try:
        phys = int(getattr(pltpu.get_tpu_info(), "vmem_capacity_bytes", 64 << 20))
    except Exception:  # pragma: no cover - conservative fallback (v7x-safe)
        phys = 64 << 20
    cap = max(32 << 20, phys - (4 << 20))
    vmem_limit = int(min(cap, max(32 << 20, int(1.25 * est) + (2 << 20))))

    kernel = functools.partial(_gate_kernel, inv_h=float(1.0 / H))

    out = pl.pallas_call(
        kernel,
        out_shape=jax.ShapeDtypeStruct((rows_pad, Hp), x1.dtype),
        grid_spec=pltpu.PrefetchScalarGridSpec(
            num_scalar_prefetch=0,
            grid=(grid,),
            in_specs=[row_spec, row_spec]
                     + [param_spec] * len(p_args)
                     + [bg_spec],
            out_specs=row_spec,
        ),
        compiler_params=pltpu.CompilerParams(
            dimension_semantics=("parallel",),
            vmem_limit_bytes=vmem_limit),
    )(x1f, x2f, *p_args, bg1d)

    if rows_pad == rows and Hp == H:
        return out.reshape(B, S, H)
    return out[:rows, :H].reshape(B, S, H)


# ---------------------------------------------------------------------------
# Pure-JAX reference (module semantics, two-pass LayerNorm, f32)
# ---------------------------------------------------------------------------
def gate_reference(x1, x2, params):
    def ln(x, g, b):
        mu = jnp.mean(x, axis=-1, keepdims=True)
        var = jnp.mean((x - mu) ** 2, axis=-1, keepdims=True)
        return (x - mu) * jax.lax.rsqrt(var + EPS) * g + b

    def adapter(x, g, be, wa, ba, wb, bb):
        h = ln(x, g, be)
        h = jnp.maximum(h @ wa + ba, 0.0)
        return h @ wb + bb

    h1 = adapter(x1, params["g1"], params["be1"], params["w1a"], params["b1a"],
                 params["w1b"], params["b1b"])
    h2 = adapter(x2, params["g2"], params["be2"], params["w2a"], params["b2a"],
                 params["w2b"], params["b2b"])
    logit = (jnp.sum(h1 * params["wg1"], axis=-1, keepdims=True)
             + params["bg"][0, 0]
             + jnp.sum(h2 * params["wg2"], axis=-1, keepdims=True))
    alpha = jnp.clip(jax.nn.sigmoid(logit), 0.15, 0.85)
    return ln(h1 * alpha + (1.0 - alpha) * h2, params["gn"], params["bn"])


if __name__ == "__main__":
    H = 32                       # hidden_size (toy size; padded to 128 lanes)
    mlp_hidden_sz = 4            # reduction factor -> bottleneck dim = 8

    key = jax.random.PRNGKey(0)
    kx1, kx2, kx3, kx4, kp = jax.random.split(key, 5)
    params = init_gate_params(kp, H, mlp_hidden_sz)

    prep_f32 = prepare_gate_params(params)                          # exact MXU path
    prep_bf16 = prepare_gate_params(params, mxu_dtype=jnp.bfloat16)  # fast MXU path (opt-in)

    # Case 1: rows divide the tile evenly (single tile), f32 MXU operands.
    x1 = jax.random.normal(kx1, (2, 8, H), jnp.float32)
    x2 = jax.random.normal(kx2, (2, 8, H), jnp.float32)
    ref = gate_reference(x1, x2, params)
    out = jax.block_until_ready(gate_forward(x1, x2, prep_f32))
    assert out.shape == x1.shape
    assert jnp.allclose(out, ref, atol=1e-4, rtol=1e-4), "mismatch vs reference (f32)"

    # Case 2: bf16 MXU operands (looser tolerance, explicit opt-in).
    out_bf = jax.block_until_ready(gate_forward(x1, x2, prep_bf16))
    assert jnp.allclose(out_bf, ref, atol=5e-2, rtol=5e-2), "mismatch vs reference (bf16 MXU)"

    # Case 3: ragged row count -> exercises cdiv grid + row-padding path.
    y1 = jax.random.normal(kx3, (2, 9, H), jnp.float32)
    y2 = jax.random.normal(kx4, (2, 9, H), jnp.float32)
    out2 = jax.block_until_ready(gate_forward(y1, y2, prep_f32, row_tile=16))
    ref2 = gate_reference(y1, y2, params)
    assert out2.shape == y1.shape
    assert jnp.allclose(out2, ref2, atol=1e-4, rtol=1e-4), "mismatch vs reference (ragged)"

    print("KERNEL_OK")
</pallas_src>

<mosaic_0001>
module attributes {stable_mosaic.version = 11 : i64} {
  func.func @_gate_kernel(%arg0: i32, %arg1: memref<16x128xf32, #tpu.memory_space<vmem>>, %arg2: memref<16x128xf32, #tpu.memory_space<vmem>>, %arg3: memref<1x128xf32, #tpu.memory_space<vmem>>, %arg4: memref<1x128xf32, #tpu.memory_space<vmem>>, %arg5: memref<128x128xf32, #tpu.memory_space<vmem>>, %arg6: memref<1x128xf32, #tpu.memory_space<vmem>>, %arg7: memref<128x128xf32, #tpu.memory_space<vmem>>, %arg8: memref<1x128xf32, #tpu.memory_space<vmem>>, %arg9: memref<1x128xf32, #tpu.memory_space<vmem>>, %arg10: memref<1x128xf32, #tpu.memory_space<vmem>>, %arg11: memref<128x128xf32, #tpu.memory_space<vmem>>, %arg12: memref<1x128xf32, #tpu.memory_space<vmem>>, %arg13: memref<128x128xf32, #tpu.memory_space<vmem>>, %arg14: memref<1x128xf32, #tpu.memory_space<vmem>>, %arg15: memref<1x128xf32, #tpu.memory_space<vmem>>, %arg16: memref<1x128xf32, #tpu.memory_space<vmem>>, %arg17: memref<1x128xf32, #tpu.memory_space<vmem>>, %arg18: memref<1x128xf32, #tpu.memory_space<vmem>>, %arg19: memref<1xf32, #tpu.memory_space<smem>>, %arg20: memref<16x128xf32, #tpu.memory_space<vmem>>) attributes {dimension_semantics = [#tpu.dimension_semantics<parallel>], iteration_bounds = array<i64: 1>, scalar_prefetch = 0 : i64, scratch_operands = 0 : i64, tpu.core_type = #tpu.core_type<tc>, window_params = [{transform_indices = @transform_0, window_bounds = array<i64: 16, 128>}, {transform_indices = @transform_1, window_bounds = array<i64: 16, 128>}, {pipeline_mode = #tpu.pipeline_mode<synchronous>, transform_indices = @transform_2, window_bounds = array<i64: 1, 128>}, {pipeline_mode = #tpu.pipeline_mode<synchronous>, transform_indices = @transform_3, window_bounds = array<i64: 1, 128>}, {pipeline_mode = #tpu.pipeline_mode<synchronous>, transform_indices = @transform_4, window_bounds = array<i64: 128, 128>}, {pipeline_mode = #tpu.pipeline_mode<synchronous>, transform_indices = @transform_5, window_bounds = array<i64: 1, 128>}, {pipeline_mode = #tpu.pipeline_mode<synchronous>, transform_indices = @transform_6, window_bounds = array<i64: 128, 128>}, {pipeline_mode = #tpu.pipeline_mode<synchronous>, transform_indices = @transform_7, window_bounds = array<i64: 1, 128>}, {pipeline_mode = #tpu.pipeline_mode<synchronous>, transform_indices = @transform_8, window_bounds = array<i64: 1, 128>}, {pipeline_mode = #tpu.pipeline_mode<synchronous>, transform_indices = @transform_9, window_bounds = array<i64: 1, 128>}, {pipeline_mode = #tpu.pipeline_mode<synchronous>, transform_indices = @transform_10, window_bounds = array<i64: 128, 128>}, {pipeline_mode = #tpu.pipeline_mode<synchronous>, transform_indices = @transform_11, window_bounds = array<i64: 1, 128>}, {pipeline_mode = #tpu.pipeline_mode<synchronous>, transform_indices = @transform_12, window_bounds = array<i64: 128, 128>}, {pipeline_mode = #tpu.pipeline_mode<synchronous>, transform_indices = @transform_13, window_bounds = array<i64: 1, 128>}, {pipeline_mode = #tpu.pipeline_mode<synchronous>, transform_indices = @transform_14, window_bounds = array<i64: 1, 128>}, {pipeline_mode = #tpu.pipeline_mode<synchronous>, transform_indices = @transform_15, window_bounds = array<i64: 1, 128>}, {pipeline_mode = #tpu.pipeline_mode<synchronous>, transform_indices = @transform_16, window_bounds = array<i64: 1, 128>}, {pipeline_mode = #tpu.pipeline_mode<synchronous>, transform_indices = @transform_17, window_bounds = array<i64: 1, 128>}, {transform_indices = @transform_18, window_bounds = array<i64: 1>}, {transform_indices = @transform_19, window_bounds = array<i64: 16, 128>}]} {
    %c0 = arith.constant 0 : index
    %c0_0 = arith.constant 0 : index
    %0 = vector.load %arg1[%c0, %c0_0] : memref<16x128xf32, #tpu.memory_space<vmem>>, vector<16x128xf32>
    %c0_1 = arith.constant 0 : index
    %c0_2 = arith.constant 0 : index
    %1 = vector.load %arg2[%c0_1, %c0_2] : memref<16x128xf32, #tpu.memory_space<vmem>>, vector<16x128xf32>
    %c0_3 = arith.constant 0 : index
    %c0_4 = arith.constant 0 : index
    %2 = vector.load %arg3[%c0_3, %c0_4] : memref<1x128xf32, #tpu.memory_space<vmem>>, vector<1x128xf32>
    %c0_5 = arith.constant 0 : index
    %c0_6 = arith.constant 0 : index
    %3 = vector.load %arg4[%c0_5, %c0_6] : memref<1x128xf32, #tpu.memory_space<vmem>>, vector<1x128xf32>
    %c0_7 = arith.constant 0 : index
    %c0_8 = arith.constant 0 : index
    %4 = vector.load %arg5[%c0_7, %c0_8] : memref<128x128xf32, #tpu.memory_space<vmem>>, vector<128x128xf32>
    %c0_9 = arith.constant 0 : index
    %c0_10 = arith.constant 0 : index
    %5 = vector.load %arg6[%c0_9, %c0_10] : memref<1x128xf32, #tpu.memory_space<vmem>>, vector<1x128xf32>
    %c0_11 = arith.constant 0 : index
    %c0_12 = arith.constant 0 : index
    %6 = vector.load %arg7[%c0_11, %c0_12] : memref<128x128xf32, #tpu.memory_space<vmem>>, vector<128x128xf32>
    %c0_13 = arith.constant 0 : index
    %c0_14 = arith.constant 0 : index
    %7 = vector.load %arg8[%c0_13, %c0_14] : memref<1x128xf32, #tpu.memory_space<vmem>>, vector<1x128xf32>
    %cst = arith.constant dense<0.000000e+00> : vector<16xf32>
    %8 = vector.multi_reduction <add>, %0, %cst [1] : vector<16x128xf32> to vector<16xf32>
    %9 = vector.shape_cast %8 : vector<16xf32> to vector<16x1xf32>
    %cst_15 = arith.constant 3.125000e-02 : f32
    %10 = vector.broadcast %cst_15 : f32 to vector<16x1xf32>
    %11 = arith.mulf %9, %10 : vector<16x1xf32>
    %12 = arith.mulf %0, %0 : vector<16x128xf32>
    %cst_16 = arith.constant dense<0.000000e+00> : vector<16xf32>
    %13 = vector.multi_reduction <add>, %12, %cst_16 [1] : vector<16x128xf32> to vector<16xf32>
    %14 = vector.shape_cast %13 : vector<16xf32> to vector<16x1xf32>
    %cst_17 = arith.constant 3.125000e-02 : f32
    %15 = vector.broadcast %cst_17 : f32 to vector<16x1xf32>
    %16 = arith.mulf %14, %15 : vector<16x1xf32>
    %17 = arith.mulf %11, %11 : vector<16x1xf32>
    %18 = arith.subf %16, %17 : vector<16x1xf32>
    %19 = vector.broadcast %11 : vector<16x1xf32> to vector<16x128xf32>
    %20 = arith.subf %0, %19 : vector<16x128xf32>
    %cst_18 = arith.constant 9.99999974E-6 : f32
    %21 = vector.broadcast %cst_18 : f32 to vector<16x1xf32>
    %22 = arith.addf %18, %21 : vector<16x1xf32>
    %23 = math.rsqrt %22 : vector<16x1xf32>
    %24 = vector.broadcast %23 : vector<16x1xf32> to vector<16x128xf32>
    %25 = arith.mulf %20, %24 : vector<16x128xf32>
    %26 = vector.broadcast %2 : vector<1x128xf32> to vector<16x128xf32>
    %27 = arith.mulf %25, %26 : vector<16x128xf32>
    %28 = vector.broadcast %3 : vector<1x128xf32> to vector<16x128xf32>
    %29 = arith.addf %27, %28 : vector<16x128xf32>
    %cst_19 = arith.constant dense<0.000000e+00> : vector<16x128xf32>
    %30 = tpu.matmul %29, %4, %cst_19 {dimension_numbers = #tpu.dot_dimension_numbers<[1], [0], [0], [1], [0, 0, 1, 1], [], []>} : vector<16x128xf32>, vector<128x128xf32>, vector<16x128xf32> -> vector<16x128xf32>
    %31 = vector.broadcast %5 : vector<1x128xf32> to vector<16x128xf32>
    %32 = arith.addf %30, %31 : vector<16x128xf32>
    %cst_20 = arith.constant 0.000000e+00 : f32
    %33 = vector.broadcast %cst_20 : f32 to vector<16x128xf32>
    %34 = arith.maximumf %32, %33 : vector<16x128xf32>
    %cst_21 = arith.constant dense<0.000000e+00> : vector<16x128xf32>
    %35 = tpu.matmul %34, %6, %cst_21 {dimension_numbers = #tpu.dot_dimension_numbers<[1], [0], [0], [1], [0, 0, 1, 1], [], []>} : vector<16x128xf32>, vector<128x128xf32>, vector<16x128xf32> -> vector<16x128xf32>
    %36 = vector.broadcast %7 : vector<1x128xf32> to vector<16x128xf32>
    %37 = arith.addf %35, %36 : vector<16x128xf32>
    %c0_22 = arith.constant 0 : index
    %c0_23 = arith.constant 0 : index
    %38 = vector.load %arg9[%c0_22, %c0_23] : memref<1x128xf32, #tpu.memory_space<vmem>>, vector<1x128xf32>
    %c0_24 = arith.constant 0 : index
    %c0_25 = arith.constant 0 : index
    %39 = vector.load %arg10[%c0_24, %c0_25] : memref<1x128xf32, #tpu.memory_space<vmem>>, vector<1x128xf32>
    %c0_26 = arith.constant 0 : index
    %c0_27 = arith.constant 0 : index
    %40 = vector.load %arg11[%c0_26, %c0_27] : memref<128x128xf32, #tpu.memory_space<vmem>>, vector<128x128xf32>
    %c0_28 = arith.constant 0 : index
    %c0_29 = arith.constant 0 : index
    %41 = vector.load %arg12[%c0_28, %c0_29] : memref<1x128xf32, #tpu.memory_space<vmem>>, vector<1x128xf32>
    %c0_30 = arith.constant 0 : index
    %c0_31 = arith.constant 0 : index
    %42 = vector.load %arg13[%c0_30, %c0_31] : memref<128x128xf32, #tpu.memory_space<vmem>>, vector<128x128xf32>
    %c0_32 = arith.constant 0 : index
    %c0_33 = arith.constant 0 : index
    %43 = vector.load %arg14[%c0_32, %c0_33] : memref<1x128xf32, #tpu.memory_space<vmem>>, vector<1x128xf32>
    %cst_34 = arith.constant dense<0.000000e+00> : vector<16xf32>
    %44 = vector.multi_reduction <add>, %1, %cst_34 [1] : vector<16x128xf32> to vector<16xf32>
    %45 = vector.shape_cast %44 : vector<16xf32> to vector<16x1xf32>
    %cst_35 = arith.constant 3.125000e-02 : f32
    %46 = vector.broadcast %cst_35 : f32 to vector<16x1xf32>
    %47 = arith.mulf %45, %46 : vector<16x1xf32>
    %48 = arith.mulf %1, %1 : vector<16x128xf32>
    %cst_36 = arith.constant dense<0.000000e+00> : vector<16xf32>
    %49 = vector.multi_reduction <add>, %48, %cst_36 [1] : vector<16x128xf32> to vector<16xf32>
    %50 = vector.shape_cast %49 : vector<16xf32> to vector<16x1xf32>
    %cst_37 = arith.constant 3.125000e-02 : f32
    %51 = vector.broadcast %cst_37 : f32 to vector<16x1xf32>
    %52 = arith.mulf %50, %51 : vector<16x1xf32>
    %53 = arith.mulf %47, %47 : vector<16x1xf32>
    %54 = arith.subf %52, %53 : vector<16x1xf32>
    %55 = vector.broadcast %47 : vector<16x1xf32> to vector<16x128xf32>
    %56 = arith.subf %1, %55 : vector<16x128xf32>
    %cst_38 = arith.constant 9.99999974E-6 : f32
    %57 = vector.broadcast %cst_38 : f32 to vector<16x1xf32>
    %58 = arith.addf %54, %57 : vector<16x1xf32>
    %59 = math.rsqrt %58 : vector<16x1xf32>
    %60 = vector.broadcast %59 : vector<16x1xf32> to vector<16x128xf32>
    %61 = arith.mulf %56, %60 : vector<16x128xf32>
    %62 = vector.broadcast %38 : vector<1x128xf32> to vector<16x128xf32>
    %63 = arith.mulf %61, %62 : vector<16x128xf32>
    %64 = vector.broadcast %39 : vector<1x128xf32> to vector<16x128xf32>
    %65 = arith.addf %63, %64 : vector<16x128xf32>
    %cst_39 = arith.constant dense<0.000000e+00> : vector<16x128xf32>
    %66 = tpu.matmul %65, %40, %cst_39 {dimension_numbers = #tpu.dot_dimension_numbers<[1], [0], [0], [1], [0, 0, 1, 1], [], []>} : vector<16x128xf32>, vector<128x128xf32>, vector<16x128xf32> -> vector<16x128xf32>
    %67 = vector.broadcast %41 : vector<1x128xf32> to vector<16x128xf32>
    %68 = arith.addf %66, %67 : vector<16x128xf32>
    %cst_40 = arith.constant 0.000000e+00 : f32
    %69 = vector.broadcast %cst_40 : f32 to vector<16x128xf32>
    %70 = arith.maximumf %68, %69 : vector<16x128xf32>
    %cst_41 = arith.constant dense<0.000000e+00> : vector<16x128xf32>
    %71 = tpu.matmul %70, %42, %cst_41 {dimension_numbers = #tpu.dot_dimension_numbers<[1], [0], [0], [1], [0, 0, 1, 1], [], []>} : vector<16x128xf32>, vector<128x128xf32>, vector<16x128xf32> -> vector<16x128xf32>
    %72 = vector.broadcast %43 : vector<1x128xf32> to vector<16x128xf32>
    %73 = arith.addf %71, %72 : vector<16x128xf32>
    %c0_42 = arith.constant 0 : index
    %c0_43 = arith.constant 0 : index
    %74 = vector.load %arg15[%c0_42, %c0_43] : memref<1x128xf32, #tpu.memory_space<vmem>>, vector<1x128xf32>
    %75 = vector.broadcast %74 : vector<1x128xf32> to vector<16x128xf32>
    %76 = arith.mulf %37, %75 : vector<16x128xf32>
    %c0_44 = arith.constant 0 : index
    %c0_45 = arith.constant 0 : index
    %77 = vector.load %arg16[%c0_44, %c0_45] : memref<1x128xf32, #tpu.memory_space<vmem>>, vector<1x128xf32>
    %78 = vector.broadcast %77 : vector<1x128xf32> to vector<16x128xf32>
    %79 = arith.mulf %73, %78 : vector<16x128xf32>
    %80 = arith.addf %76, %79 : vector<16x128xf32>
    %cst_46 = arith.constant dense<0.000000e+00> : vector<16xf32>
    %81 = vector.multi_reduction <add>, %80, %cst_46 [1] : vector<16x128xf32> to vector<16xf32>
    %82 = vector.shape_cast %81 : vector<16xf32> to vector<16x1xf32>
    %c0_47 = arith.constant 0 : index
    %83 = memref.load %arg19[%c0_47] : memref<1xf32, #tpu.memory_space<smem>>
    %84 = vector.broadcast %83 : f32 to vector<16x1xf32>
    %85 = arith.addf %82, %84 : vector<16x1xf32>
    %86 = arith.negf %85 : vector<16x1xf32>
    %87 = math.exp %86 : vector<16x1xf32>
    %cst_48 = arith.constant 1.000000e+00 : f32
    %88 = vector.broadcast %cst_48 : f32 to vector<16x1xf32>
    %89 = arith.addf %88, %87 : vector<16x1xf32>
    %90 = arith.divf %88, %89 : vector<16x1xf32>
    %cst_49 = arith.constant 1.500000e-01 : f32
    %cst_50 = arith.constant 8.500000e-01 : f32
    %91 = vector.broadcast %cst_49 : f32 to vector<16x1xf32>
    %92 = arith.maximumf %91, %90 : vector<16x1xf32>
    %93 = vector.broadcast %cst_50 : f32 to vector<16x1xf32>
    %94 = arith.minimumf %93, %92 : vector<16x1xf32>
    %95 = vector.broadcast %94 : vector<16x1xf32> to vector<16x128xf32>
    %96 = arith.mulf %37, %95 : vector<16x128xf32>
    %cst_51 = arith.constant 1.000000e+00 : f32
    %97 = vector.broadcast %cst_51 : f32 to vector<16x1xf32>
    %98 = arith.subf %97, %94 : vector<16x1xf32>
    %99 = vector.broadcast %98 : vector<16x1xf32> to vector<16x128xf32>
    %100 = arith.mulf %99, %73 : vector<16x128xf32>
    %101 = arith.addf %96, %100 : vector<16x128xf32>
    %c0_52 = arith.constant 0 : index
    %c0_53 = arith.constant 0 : index
    %102 = vector.load %arg17[%c0_52, %c0_53] : memref<1x128xf32, #tpu.memory_space<vmem>>, vector<1x128xf32>
    %c0_54 = arith.constant 0 : index
    %c0_55 = arith.constant 0 : index
    %103 = vector.load %arg18[%c0_54, %c0_55] : memref<1x128xf32, #tpu.memory_space<vmem>>, vector<1x128xf32>
    %cst_56 = arith.constant dense<0.000000e+00> : vector<16xf32>
    %104 = vector.multi_reduction <add>, %101, %cst_56 [1] : vector<16x128xf32> to vector<16xf32>
    %105 = vector.shape_cast %104 : vector<16xf32> to vector<16x1xf32>
    %cst_57 = arith.constant 3.125000e-02 : f32
    %106 = vector.broadcast %cst_57 : f32 to vector<16x1xf32>
    %107 = arith.mulf %105, %106 : vector<16x1xf32>
    %108 = arith.mulf %101, %101 : vector<16x128xf32>
    %cst_58 = arith.constant dense<0.000000e+00> : vector<16xf32>
    %109 = vector.multi_reduction <add>, %108, %cst_58 [1] : vector<16x128xf32> to vector<16xf32>
    %110 = vector.shape_cast %109 : vector<16xf32> to vector<16x1xf32>
    %cst_59 = arith.constant 3.125000e-02 : f32
    %111 = vector.broadcast %cst_59 : f32 to vector<16x1xf32>
    %112 = arith.mulf %110, %111 : vector<16x1xf32>
    %113 = arith.mulf %107, %107 : vector<16x1xf32>
    %114 = arith.subf %112, %113 : vector<16x1xf32>
    %115 = vector.broadcast %107 : vector<16x1xf32> to vector<16x128xf32>
    %116 = arith.subf %101, %115 : vector<16x128xf32>
    %cst_60 = arith.constant 9.99999974E-6 : f32
    %117 = vector.broadcast %cst_60 : f32 to vector<16x1xf32>
    %118 = arith.addf %114, %117 : vector<16x1xf32>
    %119 = math.rsqrt %118 : vector<16x1xf32>
    %120 = vector.broadcast %119 : vector<16x1xf32> to vector<16x128xf32>
    %121 = arith.mulf %116, %120 : vector<16x128xf32>
    %122 = vector.broadcast %102 : vector<1x128xf32> to vector<16x128xf32>
    %123 = arith.mulf %121, %122 : vector<16x128xf32>
    %124 = vector.broadcast %103 : vector<1x128xf32> to vector<16x128xf32>
    %125 = arith.addf %123, %124 : vector<16x128xf32>
    %c0_61 = arith.constant 0 : index
    %c0_62 = arith.constant 0 : index
    %126 = vector.load %arg20[%c0_61, %c0_62] : memref<16x128xf32, #tpu.memory_space<vmem>>, vector<16x128xf32>
    tpu.vector_store %arg20[%c0_61, %c0_62], %125 {strides = array<i32>} : memref<16x128xf32, #tpu.memory_space<vmem>>, vector<16x128xf32>,
    return
  }
  func.func @transform_0(%arg0: i32) -> (i32, i32) {
    %c0_i32 = arith.constant 0 : i32
    %c0_i32_0 = arith.constant 0 : i32
    return %arg0, %c0_i32 : i32, i32
  }
  func.func @transform_1(%arg0: i32) -> (i32, i32) {
    %c0_i32 = arith.constant 0 : i32
    %c0_i32_0 = arith.constant 0 : i32
    return %arg0, %c0_i32 : i32, i32
  }
  func.func @transform_2(%arg0: i32) -> (i32, i32) {
    %c0_i32 = arith.constant 0 : i32
    %c0_i32_0 = arith.constant 0 : i32
    %c0_i32_1 = arith.constant 0 : i32
    return %c0_i32, %c0_i32_0 : i32, i32
  }
  func.func @transform_3(%arg0: i32) -> (i32, i32) {
    %c0_i32 = arith.constant 0 : i32
    %c0_i32_0 = arith.constant 0 : i32
    %c0_i32_1 = arith.constant 0 : i32
    return %c0_i32, %c0_i32_0 : i32, i32
  }
  func.func @transform_4(%arg0: i32) -> (i32, i32) {
    %c0_i32 = arith.constant 0 : i32
    %c0_i32_0 = arith.constant 0 : i32
    %c0_i32_1 = arith.constant 0 : i32
    return %c0_i32, %c0_i32_0 : i32, i32
  }
  func.func @transform_5(%arg0: i32) -> (i32, i32) {
    %c0_i32 = arith.constant 0 : i32
    %c0_i32_0 = arith.constant 0 : i32
    %c0_i32_1 = arith.constant 0 : i32
    return %c0_i32, %c0_i32_0 : i32, i32
  }
  func.func @transform_6(%arg0: i32) -> (i32, i32) {
    %c0_i32 = arith.constant 0 : i32
    %c0_i32_0 = arith.constant 0 : i32
    %c0_i32_1 = arith.constant 0 : i32
    return %c0_i32, %c0_i32_0 : i32, i32
  }
  func.func @transform_7(%arg0: i32) -> (i32, i32) {
    %c0_i32 = arith.constant 0 : i32
    %c0_i32_0 = arith.constant 0 : i32
    %c0_i32_1 = arith.constant 0 : i32
    return %c0_i32, %c0_i32_0 : i32, i32
  }
  func.func @transform_8(%arg0: i32) -> (i32, i32) {
    %c0_i32 = arith.constant 0 : i32
    %c0_i32_0 = arith.constant 0 : i32
    %c0_i32_1 = arith.constant 0 : i32
    return %c0_i32, %c0_i32_0 : i32, i32
  }
  func.func @transform_9(%arg0: i32) -> (i32, i32) {
    %c0_i32 = arith.constant 0 : i32
    %c0_i32_0 = arith.constant 0 : i32
    %c0_i32_1 = arith.constant 0 : i32
    return %c0_i32, %c0_i32_0 : i32, i32
  }
  func.func @transform_10(%arg0: i32) -> (i32, i32) {
    %c0_i32 = arith.constant 0 : i32
    %c0_i32_0 = arith.constant 0 : i32
    %c0_i32_1 = arith.constant 0 : i32
    return %c0_i32, %c0_i32_0 : i32, i32
  }
  func.func @transform_11(%arg0: i32) -> (i32, i32) {
    %c0_i32 = arith.constant 0 : i32
    %c0_i32_0 = arith.constant 0 : i32
    %c0_i32_1 = arith.constant 0 : i32
    return %c0_i32, %c0_i32_0 : i32, i32
  }
  func.func @transform_12(%arg0: i32) -> (i32, i32) {
    %c0_i32 = arith.constant 0 : i32
    %c0_i32_0 = arith.constant 0 : i32
    %c0_i32_1 = arith.constant 0 : i32
    return %c0_i32, %c0_i32_0 : i32, i32
  }
  func.func @transform_13(%arg0: i32) -> (i32, i32) {
    %c0_i32 = arith.constant 0 : i32
    %c0_i32_0 = arith.constant 0 : i32
    %c0_i32_1 = arith.constant 0 : i32
    return %c0_i32, %c0_i32_0 : i32, i32
  }
  func.func @transform_14(%arg0: i32) -> (i32, i32) {
    %c0_i32 = arith.constant 0 : i32
    %c0_i32_0 = arith.constant 0 : i32
    %c0_i32_1 = arith.constant 0 : i32
    return %c0_i32, %c0_i32_0 : i32, i32
  }
  func.func @transform_15(%arg0: i32) -> (i32, i32) {
    %c0_i32 = arith.constant 0 : i32
    %c0_i32_0 = arith.constant 0 : i32
    %c0_i32_1 = arith.constant 0 : i32
    return %c0_i32, %c0_i32_0 : i32, i32
  }
  func.func @transform_16(%arg0: i32) -> (i32, i32) {
    %c0_i32 = arith.constant 0 : i32
    %c0_i32_0 = arith.constant 0 : i32
    %c0_i32_1 = arith.constant 0 : i32
    return %c0_i32, %c0_i32_0 : i32, i32
  }
  func.func @transform_17(%arg0: i32) -> (i32, i32) {
    %c0_i32 = arith.constant 0 : i32
    %c0_i32_0 = arith.constant 0 : i32
    %c0_i32_1 = arith.constant 0 : i32
    return %c0_i32, %c0_i32_0 : i32, i32
  }
  func.func @transform_18(%arg0: i32) -> i32 {
    %c0_i32 = arith.constant 0 : i32
    %c0_i32_0 = arith.constant 0 : i32
    return %c0_i32 : i32
  }
  func.func @transform_19(%arg0: i32) -> (i32, i32) {
    %c0_i32 = arith.constant 0 : i32
    %c0_i32_0 = arith.constant 0 : i32
    return %arg0, %c0_i32 : i32, i32
  }
}

</mosaic_0001>

<bundles_post_ra>
// kernel: gate_forward.1
= control target key start
LH: loop header
LB: loop body
LE: loop exit
PB: predicated region body
PF: predicated region fallthrough
CT: control target
= control target key end

     0   :  { %s967_s0 = inlined_call_operand.vmem [shape: f32[16,128], index: 0, kind: input, shape index: {}]   ;;  %s968_s1 = inlined_call_operand.vmem [shape: f32[16,128], index: 1, kind: input, shape index: {}]   ;;  %s969_s2 = inlined_call_operand.vmem [shape: f32[1,128], index: 2, kind: input, shape index: {}]   ;;  %s970_s3 = inlined_call_operand.vmem [shape: f32[1,128], index: 3, kind: input, shape index: {}]   ;;  %s971_s4 = inlined_call_operand.hbm [shape: f32[128,128], index: 4, kind: input, shape index: {}]   ;;  %s972_s5 = inlined_call_operand.vmem [shape: f32[1,128], index: 5, kind: input, shape index: {}]   ;;  %s973_s6 = inlined_call_operand.hbm [shape: f32[128,128], index: 6, kind: input, shape index: {}]   ;;  %s974_s7 = inlined_call_operand.vmem [shape: f32[1,128], index: 7, kind: input, shape index: {}]   ;;  %s975_s8 = inlined_call_operand.vmem [shape: f32[1,128], index: 8, kind: input, shape index: {}]   ;;  %s976_s9 = inlined_call_operand.vmem [shape: f32[1,128], index: 9, kind: input, shape index: {}]   ;;  %s977_s10 = inlined_call_operand.hbm [shape: f32[128,128], index: 10, kind: input, shape index: {}]   ;;  %s978_s11 = inlined_call_operand.vmem [shape: f32[1,128], index: 11, kind: input, shape index: {}]   ;;  %s979_s12 = inlined_call_operand.hbm [shape: f32[128,128], index: 12, kind: input, shape index: {}]   ;;  %s980_s13 = inlined_call_operand.vmem [shape: f32[1,128], index: 13, kind: input, shape index: {}]   ;;  %s981_s14 = inlined_call_operand.vmem [shape: f32[1,128], index: 14, kind: input, shape index: {}]   ;;  %s982_s15 = inlined_call_operand.vmem [shape: f32[1,128], index: 15, kind: input, shape index: {}]   ;;  %s983_s16 = inlined_call_operand.vmem [shape: f32[1,128], index: 16, kind: input, shape index: {}]   ;;  %s984_s17 = inlined_call_operand.vmem [shape: f32[1,128], index: 17, kind: input, shape index: {}]   ;;  %s985_s18 = inlined_call_operand.<no memory space> [shape: f32[1], index: 18, kind: input, shape index: {}]   ;;  %s986_s19 = inlined_call_operand.vmem [shape: f32[16,128], index: 19, kind: output, shape index: {}]  }
   0x1   :  { %989 = sst [smem:[#allocation13_spill]] %s967_s0 }
   0x2   :  { %990 = sst [smem:[#allocation14_spill]] %s968_s1 }
   0x3   :  { %991 = sst [smem:[#allocation15_spill]] %s969_s2 }
   0x4   :  { %992 = sst [smem:[#allocation16_spill]] %s970_s3 }
   0x5   :  { %25 = vsyncpa [#allocation4], 0 }
   0x6   :  { %26 = vsyncpa [#allocation6], 0 }
   0x7   :  { %27 = vsyncpa [#allocation9], 0  ;;  %s55_s20 = sshll.u32 %s973_s6, 4  ;;  %s697_s21 = smov [#allocation5]   ;;  %s56_s20 = int_to_ptr.hbm [resolvable:$true] %s55_s20 }
   0x8   :  { %s57_s1 = sshll.u32 %s697_s21, 4  ;;  %s40_s23 = sshll.u32 %s971_s4, 4  ;;  %s58_s1 = int_to_ptr.vmem [resolvable:$true] %s57_s1  ;;  %s41_s23 = int_to_ptr.hbm [resolvable:$true] %s40_s23 }
   0x9   :  { %s698_s24 = smov 128   ;;  %s699_s25 = smov 8  }
   0xa   :  { %63 = dma.hbm_to_vmem [thread:$0]  %s56_s20, 2048, %s58_s1, [#allocation6], %s698_s24, %s698_s24, %s699_s25  }
   0xb   :  { %s700_s3 = smov [#allocation3]   ;;  %s74_s29 = sshll.u32 %s977_s10, 4  ;;  %s75_s29 = int_to_ptr.hbm [resolvable:$true] %s74_s29 }
   0xc   :  { %s42_s26 = sshll.u32 %s700_s3, 4  ;;  %s89_s30 = sshll.u32 %s979_s12, 4  ;;  %s43_s26 = int_to_ptr.vmem [resolvable:$true] %s42_s26  ;;  %s90_s30 = int_to_ptr.hbm [resolvable:$true] %s89_s30 }
   0xd   :  { %48 = dma.hbm_to_vmem [thread:$0]  %s41_s23, 2048, %s43_s26, [#allocation4], %s698_s24, %s698_s24, %s699_s25  }
   0xe   :  { %s701_s21 = smov [#allocation7]   ;;  %s702_s4 = smov [#allocation8]  }
   0xf   :  { %s76_s22 = sshll.u32 %s701_s21, 4  ;;  %s91_s20 = sshll.u32 %s702_s4, 4  ;;  %s77_s22 = int_to_ptr.vmem [resolvable:$true] %s76_s22  ;;  %s92_s20 = int_to_ptr.vmem [resolvable:$true] %s91_s20 }
  0x10   :  { %82 = dma.hbm_to_vmem [thread:$0]  %s75_s29, 2048, %s77_s22, [#allocation6], %s698_s24, %s698_s24, %s699_s25  }
  0x11   :  { %97 = dma.hbm_to_vmem [thread:$0]  %s90_s30, 2048, %s92_s20, [#allocation9], %s698_s24, %s698_s24, %s699_s25  }
  0x12   :  { %691 = dma.done.wait [#allocation4], 2048  }
  0x13   :  { %692 = vsyncadd [#allocation4], 4294965248 }
  0x14   :  { %693 = dma.done.wait [#allocation6], 4096  }
  0x15   :  { %694 = vsyncadd [#allocation6], 4294963200 }
  0x16   :  { %695 = dma.done.wait [#allocation9], 2048  }
  0x17   :  { %696 = vsyncadd [#allocation9], 4294965248  ;;  %s993_s2 = sld [smem:[#allocation14_spill]]  ;;  %v147_v8 = vld [vmem:[#allocation3 + $0x78] sm:$0xff]  ;;  %v146_v10 = vld [vmem:[#allocation3 + $0x70] sm:$0xff] }
  0x18   :  { %s994_s27 = sld [smem:[#allocation13_spill]]  ;;  %v291_v9 = vld [vmem:[#allocation7 + $0x78] sm:$0xff]  ;;  %223 = vmatpush.msra.mxu0 %v147_v8  ;;  %v290_v11 = vld [vmem:[#allocation7 + $0x70] sm:$0xff]  ;;  %v145_v12 = vld [vmem:[#allocation3 + $0x68] sm:$0xff] }
  0x19   :  { %367 = vmatpush.msra.mxu2 %v291_v9  ;;  %v289_v13 = vld [vmem:[#allocation7 + $0x68] sm:$0xff]  ;;  %v144_v14 = vld [vmem:[#allocation3 + $0x60] sm:$0xff]  ;;  %v143_v16 = vld [vmem:[#allocation3 + $0x58] sm:$0xff]  ;;  %s997_s30 = sld [smem:[#allocation15_spill]] }
  0x1a   :  { %224 = vmatpush.msra.mxu0 %v146_v10  ;;  %v288_v15 = vld [vmem:[#allocation7 + $0x60] sm:$0xff]  ;;  %v287_v17 = vld [vmem:[#allocation7 + $0x58] sm:$0xff]  ;;  %v142_v18 = vld [vmem:[#allocation3 + $0x50] sm:$0xff]  ;;  %s1000_s20 = sld [smem:[#allocation16_spill]] }
  0x1b   :  { %368 = vmatpush.msra.mxu2 %v290_v11  ;;  %v286_v19 = vld [vmem:[#allocation7 + $0x50] sm:$0xff]  ;;  %v141_v20 = vld [vmem:[#allocation3 + $0x48] sm:$0xff]  ;;  %v140_v22 = vld [vmem:[#allocation3 + $0x40] sm:$0xff] }
  0x1c   :  { %225 = vmatpush.msra.mxu0 %v145_v12  ;;  %v285_v21 = vld [vmem:[#allocation7 + $0x48] sm:$0xff]  ;;  %v284_v23 = vld [vmem:[#allocation7 + $0x40] sm:$0xff]  ;;  %v139_v24 = vld [vmem:[#allocation3 + $0x38] sm:$0xff] }
  0x1d   :  { %v818_v0 = vld [vmem:[%s993_s2 + $0x8] sm:$0xff]  ;;  %v823_v1 = vld [vmem:[%s993_s2] sm:$0xff]  ;;  %369 = vmatpush.msra.mxu2 %v289_v13  ;;  %v283_v25 = vld [vmem:[#allocation7 + $0x38] sm:$0xff] }
  0x1e   :  { %v828_v2 = vld [vmem:[%s994_s27] sm:$0xff]  ;;  %312 = vadd.xlane.f32.xlu1 %v818_v0  ;;  %310 = vadd.xlane.f32.xlu0 %v823_v1  ;;  %v317_v3 = vmul.f32 %v818_v0, %v818_v0  ;;  %v316_v4 = vmul.f32 %v823_v1, %v823_v1  ;;  %v842_v6 = vld [vmem:[%s994_s27 + $0x8] sm:$0xff]  ;;  %v138_v26 = vld [vmem:[#allocation3 + $0x30] sm:$0xff] }
  0x1f   :  { %166 = vadd.xlane.f32.xlu2 %v828_v2  ;;  %v172_v5 = vmul.f32 %v828_v2, %v828_v2  ;;  %v173_v7 = vmul.f32 %v842_v6, %v842_v6  ;;  %226 = vmatpush.msra.mxu0 %v144_v14  ;;  %v282_v27 = vld [vmem:[#allocation7 + $0x30] sm:$0xff]  ;;  %v137_v28 = vld [vmem:[#allocation3 + $0x28] sm:$0xff]  ;;  %v136_v30 = vld [vmem:[#allocation3 + $0x20] sm:$0xff] }
  0x20   :  { %370 = vmatpush.msra.mxu2 %v288_v15  ;;  %v281_v29 = vld [vmem:[#allocation7 + $0x28] sm:$0xff]  ;;  %v280_v31 = vld [vmem:[#allocation7 + $0x20] sm:$0xff]  ;;  %v135_v35 = vld [vmem:[#allocation3 + $0x18] sm:$0xff] }
  0x21   :  { %227 = vmatpush.msra.mxu0 %v143_v16  ;;  %v279_v36 = vld [vmem:[#allocation7 + $0x18] sm:$0xff]  ;;  %v134_v38 = vld [vmem:[#allocation3 + $0x10] sm:$0xff]  ;;  %v133_v42 = vld [vmem:[#allocation3 + $0x8] sm:$0xff] }
  0x22   :  { %371 = vmatpush.msra.mxu2 %v287_v17  ;;  %v278_v39 = vld [vmem:[#allocation7 + $0x10] sm:$0xff]  ;;  %v277_v43 = vld [vmem:[#allocation7 + $0x8] sm:$0xff]  ;;  %v132_v44 = vld [vmem:[#allocation3] sm:$0xff] }
  0x23   :  { %228 = vmatpush.msra.mxu0 %v142_v18  ;;  %v276_v45 = vld [vmem:[#allocation7] sm:$0xff]  ;;  %v162_v9 = vld [vmem:[#allocation5 + $0x68] sm:$0xff]  ;;  %v307_v10 = vld [vmem:[#allocation8 + $0x70] sm:$0xff] }
  0x24   :  { %372 = vmatpush.msra.mxu2 %v286_v19  ;;  %v306_v11 = vld [vmem:[#allocation8 + $0x68] sm:$0xff]  ;;  %v161_v14 = vld [vmem:[#allocation5 + $0x60] sm:$0xff] }
  0x25   :  { %229 = vmatpush.msra.mxu0 %v141_v20  ;;  %v305_v17 = vld [vmem:[#allocation8 + $0x60] sm:$0xff] }
  0x26   :  { %320 = vadd.xlane.f32.xlu1 %v317_v3  ;;  %318 = vadd.xlane.f32.xlu0 %v316_v4  ;;  %v164_v4 = vld [vmem:[#allocation5 + $0x78] sm:$0xff] }
  0x27   :  { %174 = vadd.xlane.f32.xlu2 %v172_v5  ;;  %373 = vmatpush.msra.mxu2 %v285_v21  ;;  %v163_v5 = vld [vmem:[#allocation5 + $0x70] sm:$0xff]  ;;  %v160_v21 = vld [vmem:[#allocation5 + $0x58] sm:$0xff] }
  0x28   :  { %230 = vmatpush.msra.mxu0 %v140_v22  ;;  %251 = vmatpush.msra.mxu1 %v164_v4 }
  0x29   :  { %374 = vmatpush.msra.mxu2 %v284_v23 }
  0x2a   :  { %231 = vmatpush.msra.mxu0 %v139_v24  ;;  %252 = vmatpush.msra.mxu1 %v163_v5  ;;  %v304_v24 = vld [vmem:[#allocation8 + $0x58] sm:$0xff] }
  0x2b   :  { %375 = vmatpush.msra.mxu2 %v283_v25 }
  0x2c   :  { %232 = vmatpush.msra.mxu0 %v138_v26  ;;  %253 = vmatpush.msra.mxu1 %v162_v9  ;;  %v159_v26 = vld [vmem:[#allocation5 + $0x50] sm:$0xff] }
  0x2d   :  { %376 = vmatpush.msra.mxu2 %v282_v27 }
  0x2e   :  { %168 = vadd.xlane.f32.xlu0 %v842_v6  ;;  %176 = vadd.xlane.f32.xlu1 %v173_v7  ;;  %v308_v7 = vld [vmem:[#allocation8 + $0x78] sm:$0xff] }
  0x2f   :  { %233 = vmatpush.msra.mxu0 %v137_v28  ;;  %377 = vmatpush.msra.mxu2 %v281_v29  ;;  %v303_v29 = vld [vmem:[#allocation8 + $0x50] sm:$0xff] }
  0x30   :  { %395 = vmatpush.msra.mxu3 %v308_v7  ;;  %254 = vmatpush.msra.mxu1 %v161_v14  ;;  %v153_v7 = vld [vmem:[#allocation5 + $0x20] sm:$0xff] }
  0x31   :  { %234 = vmatpush.msra.mxu0 %v136_v30  ;;  %378 = vmatpush.msra.mxu2 %v280_v31  ;;  %v158_v31 = vld [vmem:[#allocation5 + $0x48] sm:$0xff] }
  0x32   :  { %396 = vmatpush.msra.mxu3 %v307_v10  ;;  %255 = vmatpush.msra.mxu1 %v160_v21  ;;  %v298_v21 = vld [vmem:[#allocation8 + $0x28] sm:$0xff] }
  0x33   :  { %235 = vmatpush.msra.mxu0 %v135_v35  ;;  %379 = vmatpush.msra.mxu2 %v279_v36  ;;  %v157_v36 = vld [vmem:[#allocation5 + $0x40] sm:$0xff] }
  0x34   :  { %397 = vmatpush.msra.mxu3 %v306_v11  ;;  %256 = vmatpush.msra.mxu1 %v159_v26  ;;  %v567_v26 = vld [vmem:[%s972_s5] ss:$0 sm:$0xff] }
  0x35   :  { %236 = vmatpush.msra.mxu0 %v134_v38  ;;  %380 = vmatpush.msra.mxu2 %v278_v39  ;;  %v301_v39 = vld [vmem:[#allocation8 + $0x40] sm:$0xff] }
  0x36   :  { %398 = vmatpush.msra.mxu3 %v305_v17  ;;  %257 = vmatpush.msra.mxu1 %v158_v31 }
  0x37   :  { %237 = vmatpush.msra.mxu0 %v133_v42  ;;  %381 = vmatpush.msra.mxu2 %v277_v43 }
  0x38   :  { %399 = vmatpush.msra.mxu3 %v304_v24  ;;  %258 = vmatpush.msra.mxu1 %v157_v36  ;;  %v294_v24 = vld [vmem:[#allocation8 + $0x8] sm:$0xff] }
  0x39   :  { %238 = vmatpush.msra.mxu0 %v132_v44  ;;  %382 = vmatpush.msra.mxu2 %v276_v45  ;;  %v156_v45 = vld [vmem:[#allocation5 + $0x38] sm:$0xff] }
  0x3a   :  { %400 = vmatpush.msra.mxu3 %v303_v29  ;;  %259 = vmatpush.msra.mxu1 %v156_v45  ;;  %v568_v29 = vld [vmem:[%s978_s11] ss:$0 sm:$0xff] }
  0x3b   :  { %v571_v45 = vld [vmem:[%s980_s13] ss:$0 sm:$0xff] }
  0x91   :  { %v313_v32 = vpop.xlane.xlu1 %312  ;;  %v311_v33 = vpop.xlane.xlu0 %310 }
  0x92   :  { %v167_v34 = vpop.xlane.xlu2 %166  ;;  %v847_v37 = vmul.f32 0.03125, %v313_v32  ;;  %v851_v41 = vmul.f32 0.03125, %v311_v33 }
  0x93   :  { %v849_v40 = vmul.f32 0.03125, %v167_v34  ;;  %v302_v34 = vld [vmem:[#allocation8 + $0x48] sm:$0xff] }
  0x94   :  { %v325_v46 = vmul.f32 %v847_v37, %v847_v37  ;;  %v324_v50 = vmul.f32 %v851_v41, %v851_v41  ;;  %401 = vmatpush.msra.mxu3 %v302_v34 }
  0x95   :  { %v180_v47 = vmul.f32 %v849_v40, %v849_v40 }
  0x96   :  { %402 = vmatpush.msra.mxu3 %v301_v39 }
  0x99   :  { %v321_v48 = vpop.xlane.xlu1 %320  ;;  %v319_v49 = vpop.xlane.xlu0 %318 }
  0x9a   :  { %v323_v51 = vmul.f32 0.03125, %v321_v48  ;;  %v322_v52 = vmul.f32 0.03125, %v319_v49  ;;  %v175_v53 = vpop.xlane.xlu2 %174 }
  0x9b   :  { %v178_v54 = vmul.f32 0.03125, %v175_v53  ;;  %v155_v53 = vld [vmem:[#allocation5 + $0x30] sm:$0xff] }
  0x9c   :  { %v327_v55 = vsub.f32 %v323_v51, %v325_v46  ;;  %v326_v56 = vsub.f32 %v322_v52, %v324_v50  ;;  %v328_v46 = vsub.f32 %v823_v1, %v851_v41  ;;  %v565_v50 = vld [vmem:[%s975_s8] ss:$0 sm:$0xff]  ;;  %v300_v51 = vld [vmem:[#allocation8 + $0x38] sm:$0xff]  ;;  %v184_v52 = vsub.f32 %v828_v2, %v849_v40  ;;  %260 = vmatpush.msra.mxu1 %v155_v53 }
  0x9d   :  { %v182_v57 = vsub.f32 %v178_v54, %v180_v47  ;;  %v563_v1 = vld [vmem:[%s997_s30] ss:$0 sm:$0xff]  ;;  %403 = vmatpush.msra.mxu3 %v300_v51 }
  0x9e   :  { %v859_v58 = vadd.f32 1e-05, %v327_v55  ;;  %v861_v59 = vadd.f32 1e-05, %v326_v56  ;;  %v566_v56 = vld [vmem:[%s976_s9] ss:$0 sm:$0xff] }
  0x9f   :  { %v863_v60 = vadd.f32 1e-05, %v182_v57  ;;  %v299_v57 = vld [vmem:[#allocation8 + $0x30] sm:$0xff]  ;;  %v570_v47 = vld [vmem:[%s981_s14] ss:$0 sm:$0xff] }
  0xa0   :  { %575 = vrsqrt.f32 %v859_v58  ;;  %vm338_vm4 = vweird.f32 %v861_v59  ;;  %vm348_vm6 = vweird.f32 %v859_v58  ;;  %404 = vmatpush.msra.mxu3 %v299_v57  ;;  %v437_v57 = vstv %s985_s18 }
  0xa1   :  { %577 = vrsqrt.f32 %v861_v59  ;;  %v169_v61 = vpop.xlane.xlu0 %168  ;;  %v177_v62 = vpop.xlane.xlu1 %176  ;;  %vm194_vm1 = vweird.f32 %v863_v60 }
  0xa2   :  { %579 = vrsqrt.f32 %v863_v60  ;;  %v868_v63 = vmul.f32 0.03125, %v169_v61  ;;  %v179_v3 = vmul.f32 0.03125, %v177_v62  ;;  %v154_v61 = vld [vmem:[#allocation5 + $0x28] sm:$0xff]  ;;  %v329_v62 = vsub.f32 %v818_v0, %v847_v37  ;;  %405 = vmatpush.msra.mxu3 %v298_v21 }
  0xa3   :  { %261 = vmatpush.msra.mxu1 %v154_v61 }
  0xa4   :  { %v181_v8 = vmul.f32 %v868_v63, %v868_v63  ;;  %v185_v0 = vsub.f32 %v842_v6, %v868_v63  ;;  %v149_v6 = vld [vmem:[#allocation5] sm:$0xff]  ;;  %v296_v63 = vld [vmem:[#allocation8 + $0x18] sm:$0xff] }
  0xa5   :  { %262 = vmatpush.msra.mxu1 %v153_v7 }
  0xa6   :  { %v872_v12 = vpop.eup %575  ;;  %v183_v13 = vsub.f32 %v179_v3, %v181_v8 }
  0xa7   :  { %v578_v15 = vpop.eup %577  ;;  %v343_v16 = vmul.f32 %v872_v12, %v859_v58  ;;  %vm349_vm3 = vweird.f32 %v872_v12 }
  0xa8   :  { %v580_v18 = vpop.eup %579  ;;  %v333_v19 = vmul.f32 %v578_v15, %v861_v59  ;;  %v877_v20 = vadd.f32 1e-05, %v183_v13  ;;  %vm339_vm0 = vweird.f32 %v578_v15  ;;  %vm910_vm8 = vmor %vm348_vm6, %vm349_vm3  ;;  %v564_v59 = vld [vmem:[%s1000_s20] ss:$0 sm:$0xff] }
  0xa9   :  { %v344_v22 = vmul.f32 %v872_v12, %v343_v16  ;;  %v189_v23 = vmul.f32 %v580_v18, %v863_v60  ;;  %vm195_vm2 = vweird.f32 %v580_v18  ;;  %vm889_vm5 = vmor %vm338_vm4, %vm339_vm0 }
  0xaa   :  { %v334_v25 = vmul.f32 %v578_v15, %v333_v19  ;;  %581 = vrsqrt.f32 %v877_v20  ;;  %vm196_vm7 = vmor %vm194_vm1, %vm195_vm2  ;;  %vm204_vm9 = vweird.f32 %v877_v20  ;;  %v151_v19 = vld [vmem:[#allocation5 + $0x10] sm:$0xff] }
  0xab   :  { %v345_v27 = vmul.f32 0.5, %v344_v22  ;;  %v190_v28 = vmul.f32 %v580_v18, %v189_v23  ;;  %v150_v22 = vld [vmem:[#allocation5 + $0x8] sm:$0xff]  ;;  %v297_v23 = vld [vmem:[#allocation8 + $0x20] sm:$0xff] }
  0xac   :  { %v335_v30 = vmul.f32 0.5, %v334_v25  ;;  %406 = vmatpush.msra.mxu3 %v297_v23  ;;  %v293_v25 = vld [vmem:[#allocation8] sm:$0xff] }
  0xad   :  { %v346_v32 = vsub.f32 1.5, %v345_v27  ;;  %v191_v33 = vmul.f32 0.5, %v190_v28 }
  0xae   :  { %v336_v35 = vsub.f32 1.5, %v335_v30  ;;  %407 = vmatpush.msra.mxu3 %v296_v63 }
  0xaf   :  { %v192_v38 = vsub.f32 1.5, %v191_v33  ;;  %v347_v44 = vmul.f32 %v872_v12, %v346_v32 }
  0xb0   :  { %v582_v42 = vpop.eup %581  ;;  %v337_v43 = vmul.f32 %v578_v15, %v336_v35 }
  0xb1   :  { %v199_v48 = vmul.f32 %v582_v42, %v877_v20  ;;  %v193_v49 = vmul.f32 %v580_v18, %v192_v38  ;;  %v351_v60 = vsel %vm910_vm8, %v872_v12, %v347_v44  ;;  %vm205_vm10 = vweird.f32 %v582_v42  ;;  %v152_v12 = vld [vmem:[#allocation5 + $0x18] sm:$0xff]  ;;  %v295_v20 = vld [vmem:[#allocation8 + $0x10] sm:$0xff] }
  0xb2   :  { %v341_v41 = vsel %vm889_vm5, %v578_v15, %v337_v43  ;;  %v353_v10 = vmul.f32 %v351_v60, %v329_v62  ;;  %vm206_vm11 = vmor %vm204_vm9, %vm205_vm10  ;;  %263 = vmatpush.msra.mxu1 %v152_v12  ;;  %408 = vmatpush.msra.mxu3 %v295_v20  ;;  %v569_v43 = vld [vmem:[%s974_s7] ss:$0 sm:$0xff] }
  0xb3   :  { %v200_v2 = vmul.f32 %v582_v42, %v199_v48  ;;  %v197_v40 = vsel %vm196_vm7, %v580_v18, %v193_v49  ;;  %v352_v55 = vmul.f32 %v341_v41, %v328_v46  ;;  %v572_v48 = vld [vmem:[%s982_s15] ss:$0 sm:$0xff] }
  0xb4   :  { %v208_v58 = vmul.f32 %v197_v40, %v184_v52  ;;  %v358_v37 = vmul.f32 %v565_v50, %v353_v10  ;;  %264 = vmatpush.msra.mxu1 %v151_v19  ;;  %409 = vmatpush.msra.mxu3 %v294_v24 }
  0xb5   :  { %v201_v3 = vmul.f32 0.5, %v200_v2  ;;  %v357_v4 = vmul.f32 %v565_v50, %v352_v55 }
  0xb6   :  { %v213_v5 = vmul.f32 %v563_v1, %v208_v58  ;;  %v363_v17 = vadd.f32 %v566_v56, %v358_v37  ;;  %265 = vmatpush.msra.mxu1 %v150_v22  ;;  %410 = vmatpush.msra.mxu3 %v293_v25 }
  0xb7   :  { %v202_v8 = vsub.f32 1.5, %v201_v3  ;;  %v362_v9 = vadd.f32 %v566_v56, %v357_v4 }
  0xb8   :  { %v218_v11 = vadd.f32 %v564_v59, %v213_v5  ;;  %266 = vmatpush.msra.mxu1 %v149_v6 }
  0xb9   :  { %383 = vmatmul.f32.vlgmr.msra.gmra.mxu2 %v362_v9  ;;  %v203_v13 = vmul.f32 %v582_v42, %v202_v8 }
  0xba   :  { %239 = vmatmul.f32.vlgmr.msra.gmra.mxu0 %v218_v11 }
  0xbb   :  { %v207_v14 = vsel %vm206_vm11, %v582_v42, %v203_v13 }
  0xbc   :  { %v209_v15 = vmul.f32 %v207_v14, %v185_v0 }
  0xbe   :  { %v214_v16 = vmul.f32 %v563_v1, %v209_v15 }
  0xc0   :  { %v219_v18 = vadd.f32 %v564_v59, %v214_v16 }
  0xc1   :  { %386 = vmatmul.f32.gmra.mxu2 %v363_v17 }
  0xc2   :  { %242 = vmatmul.f32.gmra.mxu0 %v219_v18 }
 0x137   :  { %v240_v27 = vpop.f32.mrf.mxu0 }
 0x138   :  { %v241_v28 = vadd.f32 %v567_v26, %v240_v27 }
 0x13a   :  { %v246_v30 = vmax.f32 %v241_v28, 0.0 }
 0x13c   :  { %267 = vmatmul.f32.vlgmr.msra.gmra.mxu1 %v246_v30  ;;  %v384_v31 = vpop.f32.mrf.mxu2 }
 0x13d   :  { %v385_v32 = vadd.f32 %v568_v29, %v384_v31 }
 0x13f   :  { %v390_v33 = vmax.f32 %v385_v32, 0.0  ;;  %v243_v34 = vpop.f32.mrf.mxu0 }
 0x140   :  { %v244_v35 = vadd.f32 %v567_v26, %v243_v34 }
 0x141   :  { %411 = vmatmul.f32.vlgmr.msra.gmra.mxu3 %v390_v33 }
 0x142   :  { %v247_v36 = vmax.f32 %v244_v35, 0.0 }
 0x144   :  { %v387_v38 = vpop.f32.mrf.mxu2  ;;  %270 = vmatmul.f32.gmra.mxu1 %v247_v36 }
 0x145   :  { %v388_v39 = vadd.f32 %v568_v29, %v387_v38 }
 0x147   :  { %v391_v42 = vmax.f32 %v388_v39, 0.0 }
 0x149   :  { %414 = vmatmul.f32.gmra.mxu3 %v391_v42 }
 0x1b9   :  { %v268_v44 = vpop.f32.mrf.mxu1 }
 0x1ba   :  { %v269_v46 = vadd.f32 %v569_v43, %v268_v44 }
 0x1bc   :  { %v422_v51 = vmul.f32 %v570_v47, %v269_v46 }
 0x1c1   :  { %v271_v1 = vpop.f32.mrf.mxu1 }
 0x1c2   :  { %v948_v53 = vadd.f32 %v569_v43, %v271_v1 }
 0x1c4   :  { %v412_v49 = vpop.f32.mrf.mxu3  ;;  %v423_v40 = vmul.f32 %v570_v47, %v948_v53 }
 0x1c5   :  { %v413_v50 = vadd.f32 %v571_v45, %v412_v49 }
 0x1c7   :  { %v428_v52 = vmul.f32 %v572_v48, %v413_v50 }
 0x1c9   :  { %v430_v41 = vadd.f32 %v428_v52, %v422_v51 }
 0x1cb   :  { %432 = vadd.xlane.f32.xlu2 %v430_v41 }
 0x1cc   :  { %v415_v54 = vpop.f32.mrf.mxu3 }
 0x1cd   :  { %v416_v2 = vadd.f32 %v571_v45, %v415_v54 }
 0x1cf   :  { %v429_v55 = vmul.f32 %v572_v48, %v416_v2 }
 0x1d1   :  { %v431_v56 = vadd.f32 %v429_v55, %v423_v40 }
 0x1d3   :  { %434 = vadd.xlane.f32.xlu0 %v431_v56 }
 0x23e   :  { %v433_v58 = vpop.xlane.xlu2 %432 }
 0x23f   :  { %v438_v59 = vadd.f32 %v437_v57, %v433_v58 }
 0x241   :  { %v555_v60 = vmul.f32 -1.442695, %v438_v59 }
 0x243   :  { %583 = vpow2.f32 %v555_v60 }
 0x246   :  { %v435_v61 = vpop.xlane.xlu0 %434 }
 0x247   :  { %v439_v62 = vadd.f32 %v437_v57, %v435_v61  ;;  %v573_v61 = vld [vmem:[%s983_s16] ss:$0 sm:$0xff] }
 0x249   :  { %v584_v3 = vpop.eup %583  ;;  %v556_v4 = vmul.f32 -1.442695, %v439_v62 }
 0x24a   :  { %v446_v5 = vadd.f32 1.0, %v584_v3 }
 0x24b   :  { %585 = vpow2.f32 %v556_v4  ;;  %v574_v4 = vld [vmem:[%s984_s17] ss:$0 sm:$0xff] }
 0x24c   :  { %587 = vrcp.f32 %v446_v5  ;;  %v459_v12 = vand.u32 2147483648, %v446_v5  ;;  %v457_v0 = vand.u32 2147483647, %v446_v5  ;;  %vm453_vm13 = vweird.f32 %v446_v5 }
 0x24e   :  { %v460_v15 = vor.u32 1.1754944e-38, %v459_v12  ;;  %vm458_vm15 = vcmp.eq.f32.partialorder %v457_v0, 8.507059e+37 }
 0x251   :  { %v586_v7 = vpop.eup %585 }
 0x252   :  { %v588_v8 = vpop.eup %587  ;;  %v447_v9 = vadd.f32 1.0, %v586_v7 }
 0x253   :  { %v449_v10 = vmul.f32 %v588_v8, %v446_v5  ;;  %vm454_vm12 = vweird.f32 %v588_v8 }
 0x254   :  { %589 = vrcp.f32 %v447_v9  ;;  %vm455_vm14 = vmor %vm453_vm13, %vm454_vm12  ;;  %v474_v22 = vand.u32 2147483648, %v447_v9  ;;  %v472_v63 = vand.u32 2147483647, %v447_v9  ;;  %vm468_vm1 = vweird.f32 %v447_v9 }
 0x255   :  { %v450_v11 = vsub.f32 1.0, %v449_v10 }
 0x256   :  { %v475_v25 = vor.u32 1.1754944e-38, %v474_v22  ;;  %vm473_vm3 = vcmp.eq.f32.partialorder %v472_v63, 8.507059e+37 }
 0x257   :  { %v451_v13 = vmul.f32 %v588_v8, %v450_v11 }
 0x259   :  { %v452_v37 = vadd.f32 %v588_v8, %v451_v13 }
 0x25a   :  { %v590_v14 = vpop.eup %589 }
 0x25b   :  { %v464_v16 = vmul.f32 %v590_v14, %v447_v9  ;;  %v456_v17 = vsel %vm455_vm14, %v588_v8, %v452_v37  ;;  %vm469_vm0 = vweird.f32 %v590_v14 }
 0x25c   :  { %v461_v18 = vsel %vm458_vm15, %v460_v15, %v456_v17  ;;  %vm470_vm2 = vmor %vm468_vm1, %vm469_vm0 }
 0x25d   :  { %v465_v19 = vsub.f32 1.0, %v464_v16  ;;  %v478_v21 = vmax.f32 %v461_v18, 0.15 }
 0x25f   :  { %v480_v23 = vmin.f32 %v478_v21, 0.85  ;;  %v466_v6 = vmul.f32 %v590_v14, %v465_v19 }
 0x261   :  { %v484_v20 = vsub.f32 1.0, %v480_v23  ;;  %v467_v24 = vadd.f32 %v590_v14, %v466_v6  ;;  %v482_v26 = vmul.f32 %v480_v23, %v269_v46 }
 0x263   :  { %v486_v27 = vmul.f32 %v484_v20, %v413_v50  ;;  %v471_v28 = vsel %vm470_vm2, %v590_v14, %v467_v24 }
 0x264   :  { %v476_v29 = vsel %vm473_vm3, %v475_v25, %v471_v28 }
 0x265   :  { %v488_v30 = vadd.f32 %v486_v27, %v482_v26  ;;  %v479_v31 = vmax.f32 %v476_v29, 0.15 }
 0x267   :  { %492 = vadd.xlane.f32.xlu1 %v488_v30  ;;  %v498_v32 = vmul.f32 %v488_v30, %v488_v30  ;;  %v481_v33 = vmin.f32 %v479_v31, 0.85 }
 0x269   :  { %500 = vadd.xlane.f32.xlu0 %v498_v32  ;;  %v485_v34 = vsub.f32 1.0, %v481_v33  ;;  %v483_v35 = vmul.f32 %v481_v33, %v948_v53 }
 0x26b   :  { %v487_v36 = vmul.f32 %v485_v34, %v416_v2 }
 0x26d   :  { %v489_v38 = vadd.f32 %v487_v36, %v483_v35 }
 0x26f   :  { %494 = vadd.xlane.f32.xlu2 %v489_v38  ;;  %v499_v39 = vmul.f32 %v489_v38, %v489_v38 }
 0x271   :  { %502 = vadd.xlane.f32.xlu1 %v499_v39 }
 0x2da   :  { %v493_v42 = vpop.xlane.xlu1 %492 }
 0x2db   :  { %v496_v43 = vmul.f32 0.03125, %v493_v42 }
 0x2dc   :  { %v501_v44 = vpop.xlane.xlu0 %500 }
 0x2dd   :  { %v506_v45 = vmul.f32 %v496_v43, %v496_v43  ;;  %v504_v46 = vmul.f32 0.03125, %v501_v44  ;;  %v510_v60 = vsub.f32 %v488_v30, %v496_v43 }
 0x2df   :  { %v508_v47 = vsub.f32 %v504_v46, %v506_v45 }
 0x2e1   :  { %v512_v48 = vadd.f32 1e-05, %v508_v47 }
 0x2e2   :  { %v495_v49 = vpop.xlane.xlu2 %494 }
 0x2e3   :  { %591 = vrsqrt.f32 %v512_v48  ;;  %v497_v50 = vmul.f32 0.03125, %v495_v49  ;;  %vm520_vm5 = vweird.f32 %v512_v48 }
 0x2e4   :  { %v503_v51 = vpop.xlane.xlu1 %502 }
 0x2e5   :  { %v507_v52 = vmul.f32 %v497_v50, %v497_v50  ;;  %v505_v1 = vmul.f32 0.03125, %v503_v51  ;;  %v511_v12 = vsub.f32 %v489_v38, %v497_v50 }
 0x2e7   :  { %v509_v41 = vsub.f32 %v505_v1, %v507_v52 }
 0x2e9   :  { %v592_v53 = vpop.eup %591  ;;  %v513_v54 = vadd.f32 1e-05, %v509_v41 }
 0x2ea   :  { %v515_v2 = vmul.f32 %v592_v53, %v512_v48  ;;  %vm521_vm4 = vweird.f32 %v592_v53 }
 0x2eb   :  { %593 = vrsqrt.f32 %v513_v54  ;;  %vm522_vm6 = vmor %vm520_vm5, %vm521_vm4  ;;  %vm530_vm8 = vweird.f32 %v513_v54 }
 0x2ec   :  { %v516_v40 = vmul.f32 %v592_v53, %v515_v2 }
 0x2ee   :  { %v517_v55 = vmul.f32 0.5, %v516_v40 }
 0x2f0   :  { %v518_v56 = vsub.f32 1.5, %v517_v55 }
 0x2f1   :  { %v594_v57 = vpop.eup %593 }
 0x2f2   :  { %v519_v58 = vmul.f32 %v592_v53, %v518_v56  ;;  %v525_v59 = vmul.f32 %v594_v57, %v513_v54  ;;  %vm531_vm7 = vweird.f32 %v594_v57 }
 0x2f3   :  { %vm532_vm9 = vmor %vm530_vm8, %vm531_vm7 }
 0x2f4   :  { %v523_v62 = vsel %vm522_vm6, %v592_v53, %v519_v58  ;;  %v526_v3 = vmul.f32 %v594_v57, %v525_v59 }
 0x2f5   :  { %v534_v5 = vmul.f32 %v523_v62, %v510_v60 }
 0x2f6   :  { %v527_v7 = vmul.f32 0.5, %v526_v3 }
 0x2f7   :  { %v539_v8 = vmul.f32 %v573_v61, %v534_v5 }
 0x2f8   :  { %v528_v9 = vsub.f32 1.5, %v527_v7 }
 0x2f9   :  { %v544_v10 = vadd.f32 %v574_v4, %v539_v8 }
 0x2fa   :  { %v529_v11 = vmul.f32 %v594_v57, %v528_v9 }
 0x2fb   :  { %546 = vst [vmem:[%s986_s19] sm:$0xff] %v544_v10 }
 0x2fc   :  { %v533_v13 = vsel %vm532_vm9, %v594_v57, %v529_v11 }
 0x2fd   :  { %v535_v0 = vmul.f32 %v533_v13, %v511_v12 }
 0x2ff   :  { %v540_v37 = vmul.f32 %v573_v61, %v535_v0 }
 0x301   :  { %v545_v14 = vadd.f32 %v574_v4, %v540_v37 }
 0x303   :  { %547 = vst [vmem:[%s986_s19 + $0x8] sm:$0xff] %v545_v14 }
 0x304   :  { %552 = vsyncpa [#allocation4], 1 }
 0x305   :  { %553 = vsyncpa [#allocation6], 1 }
 0x306   :  { %554 = vsyncpa [#allocation9], 1 }

</bundles_post_ra>
